<compile_context>
chip_gen: v7x
topology: tpu7x:2x2x1
jax: 0.10.0
libtpu: 0.0.40
codegen_flags: <defaults>
</compile_context>

<pallas_src>
import functools

import jax
import jax.numpy as jnp
from jax.experimental import pallas as pl
from jax.experimental.pallas import tpu as pltpu

_LANE = 128
_SUBLANE = 8
_NEG_BIG = -1e30  # finite "minus infinity" bias for padded (fake) classes


def _round_up(n, m):
    return (n + m - 1) // m * m


def _vmem_capacity_bytes():
    """Trace-time VMEM capacity query; conservative (v7x per-TC) fallback."""
    try:
        return int(pltpu.get_tpu_info().vmem_capacity_bytes)
    except Exception:  # noqa: BLE001 - any query failure -> conservative default
        return 64 << 20


def _pick_batch_tile(B, D, c_pad, in_itemsize, budget_bytes, tb_cap):
    """Largest multiple-of-8 batch tile whose VMEM working set fits the budget.

    Working set (per review): double-buffered x and out tiles, PLUS the weight
    and bias which Pallas still gives 2 pipeline buffers (only the re-copy is
    skipped when the index_map is constant), PLUS ~3x tb*c_pad f32 of softmax
    temporaries (logits / shifted / exp) living in compiler scratch.
    """
    b_ceil = _round_up(max(B, _SUBLANE), _SUBLANE)
    tb = min(b_ceil, tb_cap)
    while tb > _SUBLANE:
        need = (
            2 * tb * D * in_itemsize        # x tile, double-buffered
            + 2 * D * c_pad * in_itemsize   # weight (2 pipeline buffers)
            + 2 * c_pad * 4                 # bias   (2 pipeline buffers)
            + 2 * tb * c_pad * 4            # out tile, double-buffered (f32 worst case)
            + 3 * tb * c_pad * 4            # softmax temporaries (f32)
        )
        if need <= budget_bytes:
            break
        tb //= 2
    return max((tb // _SUBLANE) * _SUBLANE, _SUBLANE)


def _linear_logsoftmax_kernel(x_ref, w_ref, b_ref, o_ref):
    # logits = x @ W_t + b ; W_t is already (D, c_pad) so this is the standard
    # contraction (no in-kernel transpose). f32 accumulation on the MXU.
    logits = jnp.dot(x_ref[...], w_ref[...], preferred_element_type=jnp.float32)
    logits = logits + b_ref[...]  # padded classes carry a -1e30 bias

    # Numerically-stable log-softmax over the class axis (f32 math;
    # exp/log go to the EUP slot, max/sum to the XLU).
    m = jnp.max(logits, axis=-1, keepdims=True)
    shifted = logits - m
    lse = jnp.log(jnp.sum(jnp.exp(shifted), axis=-1, keepdims=True))
    o_ref[...] = (shifted - lse).astype(o_ref.dtype)


@functools.partial(jax.jit, static_argnames=("matmul_dtype", "out_dtype"))
def linear_logsoftmax_classifier(x, weight, bias, *,
                                 matmul_dtype=jnp.float32, out_dtype=None):
    """x: (B, D); weight: (nclass, D) (PyTorch layout); bias: (nclass,)."""
    B, D = x.shape
    C = weight.shape[0]
    out_dtype = x.dtype if out_dtype is None else out_dtype

    c_pad = _round_up(C, _LANE)

    # Generation-aware VMEM budget / tile cap.
    if _vmem_capacity_bytes() >= (96 << 20):      # v5e / v6e: 128 MiB VMEM
        vmem_limit = 100 << 20
        budget = 92 << 20
        tb_cap = 2048
    else:                                         # v7x: 64 MiB per TensorCore
        vmem_limit = 48 << 20
        budget = 40 << 20
        tb_cap = 512

    in_itemsize = jnp.dtype(matmul_dtype).itemsize
    tb = _pick_batch_tile(B, D, c_pad, in_itemsize, budget, tb_cap)
    n_blocks = pl.cdiv(B, tb)
    # TODO(synk): on v7x, prefer an even n_blocks when B is large so both
    #             TensorCores of the chip get batch tiles.

    # One-time host-side prep of the SMALL parameters only (x is untouched):
    # transpose weight to (D, c_pad) and pad only the class dim; padded
    # classes get a huge negative bias so exp() contributes exactly 0.
    w_t = jnp.pad(weight.astype(matmul_dtype).T, ((0, 0), (0, c_pad - C)))
    b_p = jnp.pad(bias.astype(jnp.float32), (0, c_pad - C),
                  constant_values=_NEG_BIG).reshape(1, c_pad)
    x_m = x.astype(matmul_dtype)

    cost = pl.CostEstimate(
        flops=2 * B * D * c_pad + 5 * B * c_pad,
        transcendentals=B * c_pad + B,
        bytes_accessed=(in_itemsize * (B * D + D * c_pad)
                        + 4 * c_pad
                        + jnp.dtype(out_dtype).itemsize * B * c_pad),
    )

    out_p = pl.pallas_call(
        _linear_logsoftmax_kernel,
        out_shape=jax.ShapeDtypeStruct((B, c_pad), out_dtype),
        grid=(n_blocks,),
        in_specs=[
            pl.BlockSpec((tb, D), lambda i: (i, 0)),       # x: batch-tiled
            pl.BlockSpec((D, c_pad), lambda i: (0, 0)),    # weight: VMEM-resident
            pl.BlockSpec((1, c_pad), lambda i: (0, 0)),    # bias: VMEM-resident
        ],
        out_specs=pl.BlockSpec((tb, c_pad), lambda i: (i, 0)),
        compiler_params=pltpu.CompilerParams(
            dimension_semantics=("parallel",),
            vmem_limit_bytes=vmem_limit,
        ),
        cost_estimate=cost,
    )(x_m, w_t, b_p)

    if c_pad != C:
        out_p = out_p[:, :C]
    return out_p


if __name__ == "__main__":
    # Small shapes consistent with the module's forward: x (batch, input_dim)
    batch, input_dim, nclass = 8, 32, 16

    key = jax.random.PRNGKey(0)
    kx, kw, kb = jax.random.split(key, 3)

    # Deterministic init mimicking nn.Linear's uniform(-1/sqrt(D), 1/sqrt(D))
    bound = 1.0 / jnp.sqrt(jnp.float32(input_dim))
    weight = jax.random.uniform(kw, (nclass, input_dim), jnp.float32, -bound, bound)
    bias = jax.random.uniform(kb, (nclass,), jnp.float32, -bound, bound)
    x = jax.random.normal(kx, (batch, input_dim), jnp.float32)

    ref = jax.nn.log_softmax(x @ weight.T + bias, axis=1)

    # Default f32 MXU path.
    out = linear_logsoftmax_classifier(x, weight, bias)
    out = jax.block_until_ready(out)
    assert out.shape == (batch, nclass)
    assert jnp.allclose(out, ref, atol=1e-5, rtol=1e-5)

    # Optional bf16 MXU path (f32 accumulation / f32 softmax math).
    out_bf16 = linear_logsoftmax_classifier(x, weight, bias,
                                            matmul_dtype=jnp.bfloat16)
    out_bf16 = jax.block_until_ready(out_bf16)
    assert jnp.allclose(out_bf16, ref, atol=5e-2, rtol=5e-2)

    print("KERNEL_OK")
</pallas_src>

<mosaic_0001>
module attributes {stable_mosaic.version = 11 : i64} {
  func.func @_linear_logsoftmax_kernel(%arg0: i32, %arg1: memref<8x32xf32, #tpu.memory_space<vmem>>, %arg2: memref<32x128xf32, #tpu.memory_space<vmem>>, %arg3: memref<1x128xf32, #tpu.memory_space<vmem>>, %arg4: memref<8x128xf32, #tpu.memory_space<vmem>>) attributes {dimension_semantics = [#tpu.dimension_semantics<parallel>], iteration_bounds = array<i64: 1>, scalar_prefetch = 0 : i64, scratch_operands = 0 : i64, tpu.core_type = #tpu.core_type<tc>, window_params = [{transform_indices = @transform_0, window_bounds = array<i64: 8, 32>}, {pipeline_mode = #tpu.pipeline_mode<synchronous>, transform_indices = @transform_1, window_bounds = array<i64: 32, 128>}, {pipeline_mode = #tpu.pipeline_mode<synchronous>, transform_indices = @transform_2, window_bounds = array<i64: 1, 128>}, {transform_indices = @transform_3, window_bounds = array<i64: 8, 128>}]} {
    %c0 = arith.constant 0 : index
    %c0_0 = arith.constant 0 : index
    %0 = vector.load %arg1[%c0, %c0_0] : memref<8x32xf32, #tpu.memory_space<vmem>>, vector<8x32xf32>
    %c0_1 = arith.constant 0 : index
    %c0_2 = arith.constant 0 : index
    %1 = vector.load %arg2[%c0_1, %c0_2] : memref<32x128xf32, #tpu.memory_space<vmem>>, vector<32x128xf32>
    %cst = arith.constant dense<0.000000e+00> : vector<8x128xf32>
    %2 = tpu.matmul %0, %1, %cst {dimension_numbers = #tpu.dot_dimension_numbers<[1], [0], [0], [1], [0, 0, 1, 1], [], []>} : vector<8x32xf32>, vector<32x128xf32>, vector<8x128xf32> -> vector<8x128xf32>
    %c0_3 = arith.constant 0 : index
    %c0_4 = arith.constant 0 : index
    %3 = vector.load %arg3[%c0_3, %c0_4] : memref<1x128xf32, #tpu.memory_space<vmem>>, vector<1x128xf32>
    %4 = vector.broadcast %3 : vector<1x128xf32> to vector<8x128xf32>
    %5 = arith.addf %2, %4 : vector<8x128xf32>
    %cst_5 = arith.constant dense<0xFF800000> : vector<8xf32>
    %6 = vector.multi_reduction <maximumf>, %5, %cst_5 [1] : vector<8x128xf32> to vector<8xf32>
    %7 = vector.shape_cast %6 : vector<8xf32> to vector<8x1xf32>
    %8 = vector.broadcast %7 : vector<8x1xf32> to vector<8x128xf32>
    %9 = arith.subf %5, %8 : vector<8x128xf32>
    %10 = math.exp %9 : vector<8x128xf32>
    %cst_6 = arith.constant dense<0.000000e+00> : vector<8xf32>
    %11 = vector.multi_reduction <add>, %10, %cst_6 [1] : vector<8x128xf32> to vector<8xf32>
    %12 = vector.shape_cast %11 : vector<8xf32> to vector<8x1xf32>
    %13 = math.log %12 : vector<8x1xf32>
    %14 = vector.broadcast %13 : vector<8x1xf32> to vector<8x128xf32>
    %15 = arith.subf %9, %14 : vector<8x128xf32>
    %c0_7 = arith.constant 0 : index
    %c0_8 = arith.constant 0 : index
    %16 = vector.load %arg4[%c0_7, %c0_8] : memref<8x128xf32, #tpu.memory_space<vmem>>, vector<8x128xf32>
    tpu.vector_store %arg4[%c0_7, %c0_8], %15 {strides = array<i32>} : memref<8x128xf32, #tpu.memory_space<vmem>>, vector<8x128xf32>,
    return
  }
  func.func @transform_0(%arg0: i32) -> (i32, i32) {
    %c0_i32 = arith.constant 0 : i32
    %c0_i32_0 = arith.constant 0 : i32
    return %arg0, %c0_i32 : i32, i32
  }
  func.func @transform_1(%arg0: i32) -> (i32, i32) {
    %c0_i32 = arith.constant 0 : i32
    %c0_i32_0 = arith.constant 0 : i32
    %c0_i32_1 = arith.constant 0 : i32
    return %c0_i32, %c0_i32_0 : i32, i32
  }
  func.func @transform_2(%arg0: i32) -> (i32, i32) {
    %c0_i32 = arith.constant 0 : i32
    %c0_i32_0 = arith.constant 0 : i32
    %c0_i32_1 = arith.constant 0 : i32
    return %c0_i32, %c0_i32_0 : i32, i32
  }
  func.func @transform_3(%arg0: i32) -> (i32, i32) {
    %c0_i32 = arith.constant 0 : i32
    %c0_i32_0 = arith.constant 0 : i32
    return %arg0, %c0_i32 : i32, i32
  }
}

</mosaic_0001>

<bundles_post_ra>
// kernel: linear_logsoftmax_classifier.1
= control target key start
LH: loop header
LB: loop body
LE: loop exit
PB: predicated region body
PF: predicated region fallthrough
CT: control target
= control target key end

     0   :  { %v182_v3 = vmov 0.0|0.0   ;;  %vm183_vm0 = vmmov 0   ;;  %v184_v6 = vmov 0.0   ;;  %s236_s0 = inlined_call_operand.vmem [shape: f32[8,32], index: 0, kind: input, shape index: {}]   ;;  %s237_s1 = inlined_call_operand.vmem [shape: f32[32,128], index: 1, kind: input, shape index: {}]   ;;  %s238_s2 = inlined_call_operand.vmem [shape: f32[1,128], index: 2, kind: input, shape index: {}]   ;;  %s239_s3 = inlined_call_operand.hbm [shape: f32[8,128], index: 3, kind: output, shape index: {}]  }
   0x1   :  { %v16_v0 = vld [vmem:[%s237_s1] sm:$0xff]  ;;  %v17_v1 = vld [vmem:[%s237_s1 + $0x8] sm:$0xff]  ;;  %v18_v2 = vld [vmem:[%s237_s1 + $0x10] sm:$0xff]  ;;  %144 = vmatprep.subr.bf16.mxu0 %v182_v3  ;;  %141 = vmatprep.mubr.msk.f32.mxu0 %vm183_vm0, %v184_v6 }
   0x2   :  { %v145_v4 = vpack.c.bf16 %v17_v1, %v16_v0  ;;  %v19_v5 = vld [vmem:[%s237_s1 + $0x18] sm:$0xff] }
   0x3   :  { %8 = vsyncpa [#allocation3], 0  ;;  %v148_v7 = vpack.c.bf16 %v19_v5, %v18_v2  ;;  %v15_v8 = vld [vmem:[%s236_s0] sm:$0xff]  ;;  %vm27_vm1 = vcmask 261120   ;;  %s185_s0 = smov [#allocation2]  }
   0x4   :  { %146 = vmatpush3.bf16.msra.mxu0 %v145_v4  ;;  %v126_v9 = vld [vmem:[%s238_s2] ss:$0 sm:$0xff]  ;;  %s118_s1 = sshll.u32 %s185_s0, 4  ;;  %s119_s1 = int_to_ptr.vmem [resolvable:$true] %s118_s1 }
   0x5   :  { %147 = vmatprep.subr.bf16.mxu0 %v182_v3  ;;  %s158_s2 = scalar_lea.vmem %s119_s1, 128  ;;  %p163_p1 = scmp.lt.s32.totalorder %s119_s1, %s119_s1 }
   0x6   :  { %p159_p0 = scmp.ne.s32.totalorder %s119_s1, %s158_s2  ;;  %p164_p2 = scmp.lt.s32.totalorder %s158_s2, %s158_s2 }
   0x8   :  { %149 = vmatpush3.bf16.msra.mxu0 %v148_v7  ;;  %p165_p3 = por %p164_p2, %p163_p1 }
   0xa   :  { %p166_p4 = pnand %p165_p3, %p159_p0 }
   0xb   :  { %142 = vmatmul.mubr.msk.f32.vlgmr.msra.gmra.mrb[0].mxu0 %vm27_vm1, %v15_v8 }
  0xde   :  { %v97_v10 = vpop.f32.mrb[0].mxu0 }
  0xdf   :  { %v98_v11 = vadd.f32 %v126_v9, %v97_v10  ;;  %v143_v12 = vpop.f32.mrb[1].mxu0 }
  0xe1   :  { %101 = vmax.xlane.f32.xlu0 %v98_v11 }
 0x16e   :  { %v102_v13 = vpop.xlane.xlu0 %101 }
 0x16f   :  { %v103_v14 = vsub.f32 %v98_v11, %v102_v13 }
 0x171   :  { %v104_v15 = vmul.f32 1.442695, %v103_v14 }
 0x173   :  { %154 = vpow2.f32 %v104_v15 }
 0x17d   :  { %v155_v16 = vpop.eup %154 }
 0x17e   :  { %106 = vadd.xlane.f32.xlu0 %v155_v16 }
 0x20b   :  { %v107_v17 = vpop.xlane.xlu0 %106 }
 0x20c   :  { %156 = vlog2.f32 %v107_v17 }
 0x216   :  { %v157_v18 = vpop.eup %156 }
 0x217   :  { %v109_v19 = vmul.f32 0.6931472, %v157_v18 }
 0x219   :  { %v110_v20 = vsub.f32 %v103_v14, %v109_v19 }
 0x21b   :  { %111 = vst [vmem:[#allocation2] sm:$0xff] %v110_v20 }
 0x21c   :  { %169 = shalt.err (!%p166_p4)
}
 0x21d   :  { %s170_s26 = scalar_lea.hbm %s239_s3, 128 }
 0x21e   :  { %p171_p5 = scmp.ne.s32.totalorder %s239_s3, %s170_s26  ;;  %p174_p6 = scmp.lt.u32.totalorder %s170_s26, %s239_s3 }
 0x220   :  { %p176_p7 = pnand %p174_p6, %p171_p5 }
 0x222   :  { %179 = shalt.err (!%p176_p7)
}
 0x223   :  { %121 = dma.vmem_to_hbm [thread:$0]  %s119_s1, 128, %s239_s3, [#allocation3]  }
 0x224   :  { %180 = dma.done.wait [#allocation3], 128  }
 0x225   :  { %181 = vsyncadd [#allocation3], 4294967168 }
 0x226   :  { %125 = vsyncpa [#allocation3], 1 }

</bundles_post_ra>
